<compile_context>
chip_gen: v5e
topology: v5e:2x2
jax: 0.10.0
libtpu: 0.0.40
codegen_flags: <defaults>
</compile_context>

<pallas_src>
import functools

import jax
import jax.numpy as jnp
from jax.experimental import pallas as pl
from jax.experimental.pallas import tpu as pltpu


def _round_up(x, m):
    return ((x + m - 1) // m) * m


def vae_encoder_kernel(qt_ref, w1_ref, vecs_ref, b2_ref, wh_ref, bh_ref, head_ref):
    hp = jax.lax.Precision.HIGHEST
    qt = qt_ref[...]                                           # [J, TB]

    vecs = vecs_ref[...]                                       # [H, 4]
    b1 = vecs[:, 0:1]                                          # [H, 1]
    w2 = vecs[:, 1:2]
    w3 = vecs[:, 2:3]
    b3 = vecs[:, 3:4]

    # h = relu(W1 @ qT + b1)  -- [H, TB], fully lane-dense.
    h = jnp.dot(w1_ref[...], qt, preferred_element_type=jnp.float32,
                precision=hp) + b1
    h = jnp.maximum(h, 0.0)                                    # [H, TB]

    # z = relu(linear2(h))  (H -> 1): VPU multiply + sublane reduce (XLU),
    # no degenerate N=1 MXU pass.
    z = jnp.sum(h * w2, axis=0, keepdims=True) + b2_ref[0]     # [1, TB]
    z = jnp.maximum(z, 0.0)

    # h = relu(h + linear3(z))  (1 -> H): VPU broadcast outer product.
    h = jnp.maximum(h + w3 * z + b3, 0.0)                      # [H, TB]

    # Fused mu|sigma head: [2L, H] @ [H, TB] -> one lane-dense [2L, TB] store.
    head = jnp.dot(wh_ref[...], h, preferred_element_type=jnp.float32,
                   precision=hp) + bh_ref[...]
    latent = head_ref.shape[0] // 2
    row = jax.lax.broadcasted_iota(jnp.int32, head.shape, dimension=0)
    # exp only applies to the sigma half (rows >= latent); EUP exp is cheap,
    # the select runs on the VPU.
    head_ref[...] = jnp.where(row >= latent, jnp.exp(head), head)


@functools.partial(jax.jit, static_argnames=("block_b",))
def vae_encoder(q, params, *, block_b=4096):
    """Full encoder forward: returns (mu, sigma)."""
    B, J = q.shape
    H = params["w1t"].shape[0]
    two_l = params["wht"].shape[0]
    L = two_l // 2

    # Pick the number of grid steps first (bounds padding waste to ~n*127
    # rows), force >= 2 steps once B spans more than one 128-lane tile so
    # v7x's two TensorCores both get work, then derive a lane-aligned tile.
    n = -(-B // block_b)
    if B > 128:
        n = max(2, n)
    tb = _round_up(-(-B // n), 128)
    b_pad = n * tb

    qt = q.T                                                   # [J, B]
    if b_pad != B:
        qt = jnp.pad(qt, ((0, 0), (0, b_pad - B)))             # [J, B_pad]

    # VMEM budget: resident weights + double-buffered qT/headT blocks + live
    # intermediates, with margin; clamped so it is always safe on v7x (64 MiB).
    weight_bytes = 4 * (H * J + 4 * H + two_l * H + two_l + 1)
    block_bytes = 4 * 2 * tb * (J + two_l)        # double-buffered in/out blocks
    interm_bytes = 4 * 2 * tb * H                 # h + head intermediates
    vmem_limit = int(min(40 * 2**20,
                         max(8 * 2**20,
                             2 * (weight_bytes + block_bytes + interm_bytes))))

    const = lambda i: (0, 0)     # weights: same block every step -> VMEM-resident

    head_t = pl.pallas_call(
        vae_encoder_kernel,
        out_shape=jax.ShapeDtypeStruct((two_l, b_pad), jnp.float32),
        grid=(n,),
        in_specs=[
            pl.BlockSpec((J, tb), lambda i: (0, i)),           # qT (batch on lanes)
            pl.BlockSpec((H, J), const),                       # W1 [H, J]
            pl.BlockSpec((H, 4), const),                       # packed b1|w2|w3|b3
            pl.BlockSpec((1,), lambda i: (0,),
                         memory_space=pltpu.MemorySpace.SMEM),  # b2 scalar (4 B)
            pl.BlockSpec((two_l, H), const),                   # fused head weight
            pl.BlockSpec((two_l, 1), const),                   # fused head bias col
        ],
        out_specs=pl.BlockSpec((two_l, tb), lambda i: (0, i)),  # lane-dense store
        compiler_params=pltpu.CompilerParams(
            dimension_semantics=("parallel",),                  # megacore batch split
            vmem_limit_bytes=vmem_limit,
        ),
    )(
        qt,
        params["w1t"], params["vecs"], params["b2"],
        params["wht"], params["bh_col"],
    )

    mu = head_t[:L, :B].T
    sigma = head_t[L:, :B].T
    return mu, sigma


def init_params(key, num_joints, hidden_size, latent_size):
    """Deterministic synthetic init (PyTorch-style uniform(-1/sqrt(fan_in)))."""
    def linear(k, fan_in, fan_out):
        kw, kb = jax.random.split(k)
        bound = 1.0 / jnp.sqrt(fan_in)
        w = jax.random.uniform(kw, (fan_out, fan_in), jnp.float32, -bound, bound)
        b = jax.random.uniform(kb, (fan_out,), jnp.float32, -bound, bound)
        return w, b                                             # torch [out, in] layout

    k1, k2, k3, k4, k5 = jax.random.split(key, 5)
    w1, b1 = linear(k1, num_joints, hidden_size)      # [H, J], [H]
    w2, b2 = linear(k2, hidden_size, 1)               # [1, H], [1]
    w3, b3 = linear(k3, 1, hidden_size)               # [H, 1], [H]
    wmu, bmu = linear(k4, hidden_size, latent_size)   # [L, H], [L]
    wsig, bsig = linear(k5, hidden_size, latent_size)

    # Pack the four per-feature vectors into one [H, 4] column array and fuse
    # the two output heads into a single [2L, H] weight / [2L, 1] bias.
    vecs = jnp.stack([b1, w2[0, :], w3[:, 0], b3], axis=1)      # [H, 4]
    wht = jnp.concatenate([wmu, wsig], axis=0)                  # [2L, H]
    bh_col = jnp.concatenate([bmu, bsig], axis=0)[:, None]      # [2L, 1]
    return dict(w1t=w1, vecs=vecs, b2=b2, wht=wht, bh_col=bh_col)


def vae_encoder_ref(q, p):
    """Pure-JAX reference matching the PyTorch forward."""
    hp = jax.lax.Precision.HIGHEST
    b1 = p["vecs"][:, 0]
    w2 = p["vecs"][:, 1]
    w3 = p["vecs"][:, 2]
    b3 = p["vecs"][:, 3]
    h = jnp.maximum(jnp.dot(q, p["w1t"].T, precision=hp) + b1, 0.0)
    z = jnp.maximum(jnp.sum(h * w2, axis=-1, keepdims=True) + p["b2"][0], 0.0)
    h = jnp.maximum(h + z * w3 + b3, 0.0)
    head = jnp.dot(h, p["wht"].T, precision=hp) + p["bh_col"][:, 0]
    L = head.shape[-1] // 2
    return head[:, :L], jnp.exp(head[:, L:])


if __name__ == "__main__":
    num_joints, hidden_size, latent_size = 16, 32, 8
    batch = 8

    key = jax.random.PRNGKey(0)
    k_params, k_q = jax.random.split(key)
    params = init_params(k_params, num_joints, hidden_size, latent_size)
    q = jax.random.normal(k_q, (batch, num_joints), jnp.float32)

    mu, sigma = vae_encoder(q, params)
    jax.block_until_ready((mu, sigma))

    mu_ref, sigma_ref = vae_encoder_ref(q, params)
    assert mu.shape == (batch, latent_size) and sigma.shape == (batch, latent_size)
    assert jnp.allclose(mu, mu_ref, atol=1e-5, rtol=1e-5), "mu mismatch"
    assert jnp.allclose(sigma, sigma_ref, atol=1e-5, rtol=1e-5), "sigma mismatch"

    print("KERNEL_OK")
</pallas_src>

<mosaic_0001>
module attributes {stable_mosaic.version = 11 : i64} {
  func.func @vae_encoder_kernel(%arg0: i32, %arg1: memref<16x128xf32, #tpu.memory_space<vmem>>, %arg2: memref<32x16xf32, #tpu.memory_space<vmem>>, %arg3: memref<32x4xf32, #tpu.memory_space<vmem>>, %arg4: memref<1xf32, #tpu.memory_space<smem>>, %arg5: memref<16x32xf32, #tpu.memory_space<vmem>>, %arg6: memref<16x1xf32, #tpu.memory_space<vmem>>, %arg7: memref<16x128xf32, #tpu.memory_space<vmem>>) attributes {dimension_semantics = [#tpu.dimension_semantics<parallel>], iteration_bounds = array<i64: 1>, scalar_prefetch = 0 : i64, scratch_operands = 0 : i64, tpu.core_type = #tpu.core_type<tc>, window_params = [{transform_indices = @transform_0, window_bounds = array<i64: 16, 128>}, {pipeline_mode = #tpu.pipeline_mode<synchronous>, transform_indices = @transform_1, window_bounds = array<i64: 32, 16>}, {pipeline_mode = #tpu.pipeline_mode<synchronous>, transform_indices = @transform_2, window_bounds = array<i64: 32, 4>}, {transform_indices = @transform_3, window_bounds = array<i64: 1>}, {pipeline_mode = #tpu.pipeline_mode<synchronous>, transform_indices = @transform_4, window_bounds = array<i64: 16, 32>}, {pipeline_mode = #tpu.pipeline_mode<synchronous>, transform_indices = @transform_5, window_bounds = array<i64: 16, 1>}, {transform_indices = @transform_6, window_bounds = array<i64: 16, 128>}]} {
    %c0 = arith.constant 0 : index
    %c0_0 = arith.constant 0 : index
    %0 = vector.load %arg1[%c0, %c0_0] : memref<16x128xf32, #tpu.memory_space<vmem>>, vector<16x128xf32>
    %c0_1 = arith.constant 0 : index
    %c0_2 = arith.constant 0 : index
    %1 = vector.load %arg3[%c0_1, %c0_2] : memref<32x4xf32, #tpu.memory_space<vmem>>, vector<32x4xf32>
    %2 = vector.extract_strided_slice %1 {offsets = [0, 0], sizes = [32, 1], strides = [1, 1]} : vector<32x4xf32> to vector<32x1xf32>
    %3 = vector.extract_strided_slice %1 {offsets = [0, 1], sizes = [32, 1], strides = [1, 1]} : vector<32x4xf32> to vector<32x1xf32>
    %4 = vector.extract_strided_slice %1 {offsets = [0, 2], sizes = [32, 1], strides = [1, 1]} : vector<32x4xf32> to vector<32x1xf32>
    %5 = vector.extract_strided_slice %1 {offsets = [0, 3], sizes = [32, 1], strides = [1, 1]} : vector<32x4xf32> to vector<32x1xf32>
    %c0_3 = arith.constant 0 : index
    %c0_4 = arith.constant 0 : index
    %6 = vector.load %arg2[%c0_3, %c0_4] : memref<32x16xf32, #tpu.memory_space<vmem>>, vector<32x16xf32>
    %cst = arith.constant dense<0.000000e+00> : vector<32x128xf32>
    %7 = tpu.matmul %6, %0, %cst {dimension_numbers = #tpu.dot_dimension_numbers<[1], [0], [0], [1], [0, 0, 1, 1], [], []>, precision = #tpu.contract_precision<fp32>} : vector<32x16xf32>, vector<16x128xf32>, vector<32x128xf32> -> vector<32x128xf32>
    %8 = vector.broadcast %2 : vector<32x1xf32> to vector<32x128xf32>
    %9 = arith.addf %7, %8 : vector<32x128xf32>
    %cst_5 = arith.constant 0.000000e+00 : f32
    %10 = vector.broadcast %cst_5 : f32 to vector<32x128xf32>
    %11 = arith.maximumf %9, %10 : vector<32x128xf32>
    %12 = vector.broadcast %3 : vector<32x1xf32> to vector<32x128xf32>
    %13 = arith.mulf %11, %12 : vector<32x128xf32>
    %cst_6 = arith.constant dense<0.000000e+00> : vector<128xf32>
    %14 = vector.multi_reduction <add>, %13, %cst_6 [0] : vector<32x128xf32> to vector<128xf32>
    %15 = vector.shape_cast %14 : vector<128xf32> to vector<1x128xf32>
    %c0_7 = arith.constant 0 : index
    %16 = memref.load %arg4[%c0_7] : memref<1xf32, #tpu.memory_space<smem>>
    %17 = vector.broadcast %16 : f32 to vector<1x128xf32>
    %18 = arith.addf %15, %17 : vector<1x128xf32>
    %cst_8 = arith.constant 0.000000e+00 : f32
    %19 = vector.broadcast %cst_8 : f32 to vector<1x128xf32>
    %20 = arith.maximumf %18, %19 : vector<1x128xf32>
    %21 = vector.broadcast %4 : vector<32x1xf32> to vector<32x128xf32>
    %22 = vector.broadcast %20 : vector<1x128xf32> to vector<32x128xf32>
    %23 = arith.mulf %21, %22 : vector<32x128xf32>
    %24 = arith.addf %11, %23 : vector<32x128xf32>
    %25 = vector.broadcast %5 : vector<32x1xf32> to vector<32x128xf32>
    %26 = arith.addf %24, %25 : vector<32x128xf32>
    %cst_9 = arith.constant 0.000000e+00 : f32
    %27 = vector.broadcast %cst_9 : f32 to vector<32x128xf32>
    %28 = arith.maximumf %26, %27 : vector<32x128xf32>
    %c0_10 = arith.constant 0 : index
    %c0_11 = arith.constant 0 : index
    %29 = vector.load %arg5[%c0_10, %c0_11] : memref<16x32xf32, #tpu.memory_space<vmem>>, vector<16x32xf32>
    %cst_12 = arith.constant dense<0.000000e+00> : vector<16x128xf32>
    %30 = tpu.matmul %29, %28, %cst_12 {dimension_numbers = #tpu.dot_dimension_numbers<[1], [0], [0], [1], [0, 0, 1, 1], [], []>, precision = #tpu.contract_precision<fp32>} : vector<16x32xf32>, vector<32x128xf32>, vector<16x128xf32> -> vector<16x128xf32>
    %c0_13 = arith.constant 0 : index
    %c0_14 = arith.constant 0 : index
    %31 = vector.load %arg6[%c0_13, %c0_14] : memref<16x1xf32, #tpu.memory_space<vmem>>, vector<16x1xf32>
    %32 = vector.broadcast %31 : vector<16x1xf32> to vector<16x128xf32>
    %33 = arith.addf %30, %32 : vector<16x128xf32>
    %34 = tpu.iota {dimensions = array<i32: 0>} : vector<16x128xi32>
    %c8_i32 = arith.constant 8 : i32
    %35 = vector.broadcast %c8_i32 : i32 to vector<16x128xi32>
    %36 = arith.cmpi sge, %34, %35 : vector<16x128xi32>
    %37 = math.exp %33 : vector<16x128xf32>
    %38 = arith.select %36, %37, %33 : vector<16x128xi1>, vector<16x128xf32>
    %c0_15 = arith.constant 0 : index
    %c0_16 = arith.constant 0 : index
    %39 = vector.load %arg7[%c0_15, %c0_16] : memref<16x128xf32, #tpu.memory_space<vmem>>, vector<16x128xf32>
    tpu.vector_store %arg7[%c0_15, %c0_16], %38 {strides = array<i32>} : memref<16x128xf32, #tpu.memory_space<vmem>>, vector<16x128xf32>,
    return
  }
  func.func @transform_0(%arg0: i32) -> (i32, i32) {
    %c0_i32 = arith.constant 0 : i32
    %c0_i32_0 = arith.constant 0 : i32
    return %c0_i32, %arg0 : i32, i32
  }
  func.func @transform_1(%arg0: i32) -> (i32, i32) {
    %c0_i32 = arith.constant 0 : i32
    %c0_i32_0 = arith.constant 0 : i32
    %c0_i32_1 = arith.constant 0 : i32
    return %c0_i32, %c0_i32_0 : i32, i32
  }
  func.func @transform_2(%arg0: i32) -> (i32, i32) {
    %c0_i32 = arith.constant 0 : i32
    %c0_i32_0 = arith.constant 0 : i32
    %c0_i32_1 = arith.constant 0 : i32
    return %c0_i32, %c0_i32_0 : i32, i32
  }
  func.func @transform_3(%arg0: i32) -> i32 {
    %c0_i32 = arith.constant 0 : i32
    %c0_i32_0 = arith.constant 0 : i32
    return %c0_i32 : i32
  }
  func.func @transform_4(%arg0: i32) -> (i32, i32) {
    %c0_i32 = arith.constant 0 : i32
    %c0_i32_0 = arith.constant 0 : i32
    %c0_i32_1 = arith.constant 0 : i32
    return %c0_i32, %c0_i32_0 : i32, i32
  }
  func.func @transform_5(%arg0: i32) -> (i32, i32) {
    %c0_i32 = arith.constant 0 : i32
    %c0_i32_0 = arith.constant 0 : i32
    %c0_i32_1 = arith.constant 0 : i32
    return %c0_i32, %c0_i32_0 : i32, i32
  }
  func.func @transform_6(%arg0: i32) -> (i32, i32) {
    %c0_i32 = arith.constant 0 : i32
    %c0_i32_0 = arith.constant 0 : i32
    return %c0_i32, %arg0 : i32, i32
  }
}

</mosaic_0001>

<bundles_post_ra>
// kernel: vae_encoder.1
= control target key start
LH: loop header
LB: loop body
LE: loop exit
PB: predicated region body
PF: predicated region fallthrough
CT: control target
= control target key end

     0   :  { %vm54_vm0 = vcmask 130048   ;;  %v680_v3 = vmov 0   ;;  %v681_v45 = vmov 1   ;;  %v682_v46 = vmov 3   ;;  %s836_s0 = inlined_call_operand.vmem [shape: f32[16,128], index: 0, kind: input, shape index: {}]   ;;  %s837_s1 = inlined_call_operand.vmem [shape: f32[32,16], index: 1, kind: input, shape index: {}]   ;;  %s838_s2 = inlined_call_operand.vmem [shape: f32[32,4], index: 2, kind: input, shape index: {}]   ;;  %s839_s3 = inlined_call_operand.<no memory space> [shape: f32[1], index: 3, kind: input, shape index: {}]   ;;  %s840_s4 = inlined_call_operand.vmem [shape: f32[16,32], index: 4, kind: input, shape index: {}]   ;;  %s841_s5 = inlined_call_operand.vmem [shape: f32[16,1], index: 5, kind: input, shape index: {}]   ;;  %s842_s6 = inlined_call_operand.vmem [shape: f32[16,128], index: 6, kind: output, shape index: {}]  }
   0x1   :  { %v25_v0 = vld [vmem:[%s836_s0 + $0x8] sm:$0xff]  ;;  %v24_v1 = vld [vmem:[%s836_s0] sm:$0xff]  ;;  %666 = vset.pattern.permute.xlu0 %v680_v3  ;;  %667 = vset.pattern.permute.xlu1 %v680_v3  ;;  %v33_v7 = vld [vmem:[%s837_s1 + $0x18] sm:$0xff]  ;;  %v683_v47 = vmov 2   ;;  %vm418_vm1 = vcmask 261120  }
   0x2   :  { %v30_v2 = vld [vmem:[%s837_s1] sm:$0xff]  ;;  %v81_v4 = vand.u32 4294901760, %v25_v0  ;;  %v83_v5 = vand.u32 4294901760, %v24_v1  ;;  %v31_v8 = vld [vmem:[%s837_s1 + $0x8] sm:$0xff]  ;;  %v65_v11 = vsel %vm54_vm0, %v33_v7, 0  ;;  %v750_v13 = vld [vmem:[%s838_s2 + $0x10] sm:$0xff]  ;;  %668 = vset.pattern.permute.xlu2 %v681_v45 }
   0x3   :  { %v56_v6 = vsel %vm54_vm0, %v30_v2, 0  ;;  %v740_v9 = vld [vmem:[%s838_s2] sm:$0xff]  ;;  %v59_v12 = vsel %vm54_vm0, %v31_v8, 0  ;;  %v32_v14 = vld [vmem:[%s837_s1 + $0x10] sm:$0xff]  ;;  %v755_v16 = vand.u32 4294901760, %v65_v11  ;;  %46 = vperm.xlu1 %667, %v750_v13   ;;  %v770_v29 = vld [vmem:[%s838_s2 + $0x8] sm:$0xff] }
   0x4   :  { %v742_v10 = vand.u32 4294901760, %v56_v6  ;;  %36 = vperm.xlu0 %666, %v740_v9   ;;  %82 = vmatpush.msra.mxu0 %v81_v4  ;;  %v133_v15 = vsub.f32 %v25_v0, %v81_v4  ;;  %v139_v17 = vsub.f32 %v24_v1, %v83_v5  ;;  %v757_v18 = vand.u32 4294901760, %v59_v12  ;;  %v29_v36 = vld [vmem:[%s838_s2 + $0x18] sm:$0xff] }
   0x5   :  { %658 = vmatpush.msra.mxu2 %v81_v4  ;;  %v62_v20 = vsel %vm54_vm0, %v32_v14, 0  ;;  %v763_v22 = vsub.f32 %v65_v11, %v755_v16  ;;  %324 = vperm.xlu2 %668, %v740_v9  }
   0x6   :  { %v86_v19 = vsub.f32 %v56_v6, %v742_v10  ;;  %84 = vmatpush.msra.mxu0 %v83_v5  ;;  %v134_v21 = vand.u32 4294901760, %v133_v15  ;;  %v140_v23 = vand.u32 4294901760, %v139_v17  ;;  %v94_v24 = vsub.f32 %v59_v12, %v757_v18 }
   0x7   :  { %659 = vmatpush.msra.mxu2 %v83_v5  ;;  %v111_v27 = vand.u32 4294901760, %v763_v22  ;;  %v101_v32 = vand.u32 4294901760, %v62_v20 }
   0x8   :  { %v87_v25 = vand.u32 4294901760, %v86_v19  ;;  %v135_v26 = vsub.f32 %v133_v15, %v134_v21  ;;  %v141_v28 = vsub.f32 %v139_v17, %v140_v23  ;;  %262 = vmatpush.msrb.mxu0 %v134_v21  ;;  %v95_v31 = vand.u32 4294901760, %v94_v24 }
   0x9   :  { %177 = vmatpush.msrb.mxu2 %v133_v15  ;;  %v112_v34 = vsub.f32 %v763_v22, %v111_v27  ;;  %v102_v40 = vsub.f32 %v62_v20, %v101_v32 }
   0xa   :  { %v88_v30 = vsub.f32 %v86_v19, %v87_v25  ;;  %v136_v33 = vand.u32 4294901760, %v135_v26  ;;  %v142_v35 = vand.u32 4294901760, %v141_v28  ;;  %266 = vmatpush.msrb.mxu0 %v140_v23  ;;  %v96_v39 = vsub.f32 %v94_v24, %v95_v31 }
   0xb   :  { %180 = vmatpush.msrb.mxu2 %v139_v17  ;;  %v113_v38 = vand.u32 4294901760, %v112_v34  ;;  %51 = vperm.xlu1 %667, %v29_v36   ;;  %v103_v42 = vand.u32 4294901760, %v102_v40 }
   0xc   :  { %v89_v37 = vand.u32 4294901760, %v88_v30  ;;  %41 = vperm.xlu0 %666, %v770_v29   ;;  %137 = vmatpush.msra.mxu1 %v136_v33  ;;  %v97_v41 = vand.u32 4294901760, %v96_v39 }
   0xd   :  { %660 = vmatpush.msra.mxu3 %v136_v33  ;;  %114 = vmatmul.f32.vlgmr.msra.gmra.mxu2 %v113_v38  ;;  %v104_v43 = vsub.f32 %v102_v40, %v103_v42 }
   0xe   :  { %90 = vmatmul.f32.vlgmr.msra.gmra.mxu0 %v89_v37  ;;  %143 = vmatpush.msra.mxu1 %v142_v35 }
   0xf   :  { %661 = vmatpush.msra.mxu3 %v142_v35  ;;  %145 = vmatmul.f32.vlgmr.msra.gmra.mxu1 %v742_v10  ;;  %v105_v44 = vand.u32 4294901760, %v104_v43 }
  0x10   :  { %157 = vmatmul.f32.vlgmr.msra.gmra.mxu3 %v755_v16  ;;  %299 = vmatpush.msrb.mxu1 %v81_v4 }
  0x11   :  { %217 = vmatpush.msrb.mxu3 %v81_v4  ;;  %328 = vperm.xlu2 %668, %v770_v29  }
  0x12   :  { %301 = vmatpush.msrb.mxu1 %v83_v5 }
  0x13   :  { %219 = vmatpush.msrb.mxu3 %v83_v5  ;;  %670 = vset.pattern.permute.xlu1 %v681_v45 }
  0x14   :  { %669 = vset.pattern.permute.xlu0 %v681_v45  ;;  %336 = vperm.xlu1 %670, %v29_v36  }
  0x15   :  { %183 = vmatmul.f32.vlgmr.msrb.gmra.mxu2 %v86_v19  ;;  %332 = vperm.xlu0 %669, %v750_v13  }
  0x16   :  { %98 = vmatmul.f32.gmra.mxu0 %v97_v41 }
  0x17   :  { %149 = vmatmul.f32.gmra.mxu1 %v757_v18 }
  0x18   :  { %223 = vmatmul.f32.vlgmr.msrb.gmra.mxu3 %v87_v25 }
  0x19   :  { %671 = vset.pattern.permute.xlu2 %v683_v47 }
  0x1a   :  { %369 = vperm.xlu2 %671, %v29_v36  }
  0x1c   :  { %672 = vset.pattern.permute.xlu1 %v683_v47 }
  0x1d   :  { %188 = vmatmul.f32.gmra.mxu2 %v94_v24  ;;  %673 = vset.pattern.permute.xlu0 %v682_v46 }
  0x1e   :  { %106 = vmatmul.f32.gmra.mxu0 %v105_v44  ;;  %393 = vperm.xlu0 %673, %v29_v36  }
  0x1f   :  { %153 = vmatmul.f32.gmra.mxu1 %v101_v32  ;;  %365 = vperm.xlu1 %672, %v750_v13  }
  0x20   :  { %229 = vmatmul.f32.gmra.mxu3 %v95_v31 }
  0x22   :  { %361 = vperm.xlu2 %671, %v770_v29  }
  0x25   :  { %193 = vmatmul.f32.gmra.mxu2 %v102_v40 }
  0x26   :  { %268 = vmatmul.f32.vlgmr.msrb.gmra.mxu0 %v742_v10  ;;  %676 = vset.pattern.permute.xlu0 %v680_v3 }
  0x27   :  { %303 = vmatmul.f32.vlgmr.msrb.gmra.mxu1 %v742_v10  ;;  %357 = vperm.xlu1 %672, %v740_v9  }
  0x28   :  { %235 = vmatmul.f32.gmra.mxu3 %v103_v42 }
  0x2a   :  { %674 = vset.pattern.permute.xlu2 %v682_v46 }
  0x2b   :  { %389 = vperm.xlu2 %674, %v750_v13  }
  0x2d   :  { %198 = vmatmul.f32.gmra.mxu2 %v763_v22 }
  0x2e   :  { %272 = vmatmul.f32.gmra.mxu0 %v757_v18 }
  0x2f   :  { %307 = vmatmul.f32.gmra.mxu1 %v757_v18  ;;  %675 = vset.pattern.permute.xlu1 %v682_v46 }
  0x30   :  { %241 = vmatmul.f32.gmra.mxu3 %v111_v27  ;;  %385 = vperm.xlu1 %675, %v770_v29  }
  0x33   :  { %381 = vperm.xlu2 %674, %v740_v9  }
  0x36   :  { %276 = vmatmul.f32.gmra.mxu0 %v101_v32 }
  0x37   :  { %311 = vmatmul.f32.gmra.mxu1 %v101_v32 }
  0x38   :  { %677 = vset.pattern.permute.xlu1 %v680_v3 }
  0x3e   :  { %280 = vmatmul.f32.gmra.mxu0 %v755_v16 }
  0x3f   :  { %315 = vmatmul.f32.gmra.mxu1 %v755_v16 }
  0x5f   :  { %v325_v5 = vpop.permute.xlu2 %324 }
  0x6b   :  { %v329_v22 = vpop.permute.xlu2 %328 }
  0x74   :  { %v370_v40 = vpop.permute.xlu2 %369 }
  0x75   :  { %v47_v60 = vpop.permute.xlu1 %46 }
  0x76   :  { %v37_v54 = vpop.permute.xlu0 %36 }
  0x7d   :  { %v52_v10 = vpop.permute.xlu1 %51 }
  0x7e   :  { %v42_v59 = vpop.permute.xlu0 %41 }
  0x86   :  { %v337_v38 = vpop.permute.xlu1 %336 }
  0x87   :  { %v333_v37 = vpop.permute.xlu0 %332 }
  0x8b   :  { %v91_v48 = vpop.f32.mrf.mxu0 }
  0x8c   :  { %v146_v49 = vpop.f32.mrf.mxu1  ;;  %v92_v2 = vadd.f32 %v91_v48, %v37_v54 }
  0x8e   :  { %v147_v6 = vadd.f32 %v146_v49, %v92_v2 }
  0x90   :  { %v115_v50 = vpop.f32.mrf.mxu2 }
  0x91   :  { %v116_v17 = vadd.f32 %v115_v50, %v52_v10 }
  0x93   :  { %v99_v51 = vpop.f32.mrf.mxu0  ;;  %v158_v52 = vpop.f32.mrf.mxu3 }
  0x94   :  { %v150_v53 = vpop.f32.mrf.mxu1  ;;  %v100_v63 = vadd.f32 %v99_v51, %v42_v59  ;;  %v159_v26 = vadd.f32 %v158_v52, %v116_v17  ;;  %v366_v52 = vpop.permute.xlu1 %365  ;;  %v353_v59 = vstv %s839_s3 }
  0x96   :  { %v151_v3 = vadd.f32 %v150_v53, %v100_v63  ;;  %v362_v53 = vpop.permute.xlu2 %361  ;;  %v404_v63 = vld [vmem:[%s840_s4] sm:$0xff] }
  0x97   :  { %v420_v2 = vsel %vm418_vm1, %v404_v63, 0 }
  0x98   :  { %v184_v55 = vpop.f32.mrf.mxu2 }
  0x99   :  { %v185_v11 = vadd.f32 %v184_v55, %v147_v6 }
  0x9b   :  { %v107_v56 = vpop.f32.mrf.mxu0  ;;  %v224_v57 = vpop.f32.mrf.mxu3 }
  0x9c   :  { %v154_v58 = vpop.f32.mrf.mxu1  ;;  %v108_v4 = vadd.f32 %v107_v56, %v47_v60  ;;  %v225_v18 = vadd.f32 %v224_v57, %v185_v11  ;;  %v358_v60 = vpop.permute.xlu1 %357 }
  0x9e   :  { %v155_v12 = vadd.f32 %v154_v58, %v108_v4 }
  0xa0   :  { %v189_v61 = vpop.f32.mrf.mxu2 }
  0xa1   :  { %v190_v7 = vadd.f32 %v189_v61, %v151_v3  ;;  %v390_v61 = vpop.permute.xlu2 %389 }
  0xa3   :  { %v269_v62 = vpop.f32.mrf.mxu0  ;;  %v230_v0 = vpop.f32.mrf.mxu3 }
  0xa4   :  { %v304_v1 = vpop.f32.mrf.mxu1  ;;  %v231_v15 = vadd.f32 %v230_v0, %v190_v7  ;;  %v270_v20 = vadd.f32 %v269_v62, %v225_v18  ;;  %v386_v7 = vpop.permute.xlu1 %385 }
  0xa6   :  { %v305_v29 = vadd.f32 %v304_v1, %v270_v20 }
  0xa8   :  { %v194_v8 = vpop.f32.mrf.mxu2  ;;  %v319_v34 = vmax.f32 %v305_v29, 0.0 }
  0xa9   :  { %v195_v16 = vadd.f32 %v194_v8, %v155_v12  ;;  %v394_v8 = vpop.permute.xlu0 %393 }
  0xaa   :  { %v339_v44 = vmul.f32 %v325_v5, %v319_v34 }
  0xab   :  { %v273_v9 = vpop.f32.mrf.mxu0  ;;  %v236_v13 = vpop.f32.mrf.mxu3 }
  0xac   :  { %v308_v14 = vpop.f32.mrf.mxu1  ;;  %v274_v19 = vadd.f32 %v273_v9, %v231_v15  ;;  %v237_v21 = vadd.f32 %v236_v13, %v195_v16  ;;  %v809_v9 = vand.u32 4294901760, %v420_v2  ;;  %v382_v15 = vpop.permute.xlu2 %381 }
  0xae   :  { %v309_v25 = vadd.f32 %v308_v14, %v274_v19  ;;  %v405_v14 = vld [vmem:[%s840_s4 + $0x8] sm:$0xff]  ;;  %v815_v20 = vsub.f32 %v420_v2, %v809_v9 }
  0xb0   :  { %v199_v23 = vpop.f32.mrf.mxu2  ;;  %v320_v33 = vmax.f32 %v309_v25, 0.0 }
  0xb1   :  { %v200_v30 = vadd.f32 %v199_v23, %v159_v26 }
  0xb2   :  { %v340_v41 = vmul.f32 %v329_v22, %v320_v33 }
  0xb3   :  { %v277_v24 = vpop.f32.mrf.mxu0  ;;  %v242_v32 = vpop.f32.mrf.mxu3 }
  0xb4   :  { %v278_v27 = vadd.f32 %v277_v24, %v237_v21  ;;  %v312_v28 = vpop.f32.mrf.mxu1  ;;  %v243_v35 = vadd.f32 %v242_v32, %v200_v30  ;;  %v343_v47 = vadd.f32 %v340_v41, %v339_v44  ;;  %v423_v21 = vsel %vm418_vm1, %v405_v14, 0 }
  0xb5   :  { %v447_v30 = vand.u32 4294901760, %v815_v20 }
  0xb6   :  { %v313_v31 = vadd.f32 %v312_v28, %v278_v27 }
  0xb8   :  { %v321_v36 = vmax.f32 %v313_v31, 0.0  ;;  %v453_v31 = vand.u32 4294901760, %v423_v21 }
  0xba   :  { %v341_v45 = vmul.f32 %v333_v37, %v321_v36  ;;  %v454_v44 = vsub.f32 %v423_v21, %v453_v31 }
  0xbb   :  { %v281_v39 = vpop.f32.mrf.mxu0 }
  0xbc   :  { %v282_v42 = vadd.f32 %v281_v39, %v243_v35  ;;  %v316_v43 = vpop.f32.mrf.mxu1  ;;  %v344_v49 = vadd.f32 %v343_v47, %v341_v45  ;;  %v406_v39 = vld [vmem:[%s841_s5] sm:$0xff] }
  0xbd   :  { %410 = vperm.xlu1 %677, %v406_v39  }
  0xbe   :  { %v317_v46 = vadd.f32 %v316_v43, %v282_v42 }
  0xc0   :  { %v322_v48 = vmax.f32 %v317_v46, 0.0 }
  0xc2   :  { %v342_v50 = vmul.f32 %v337_v38, %v322_v48 }
  0xc4   :  { %v345_v51 = vadd.f32 %v344_v49, %v342_v50  ;;  %v455_v50 = vand.u32 4294901760, %v454_v44 }
  0xc6   :  { %v346_v54 = vrot.slane %v345_v51, 4 }
  0xc8   :  { %v347_v55 = vadd.f32 %v346_v54, %v345_v51  ;;  %v456_v54 = vsub.f32 %v454_v44, %v455_v50 }
  0xca   :  { %v348_v56 = vrot.slane %v347_v55, 2 }
  0xcc   :  { %v349_v57 = vadd.f32 %v348_v56, %v347_v55  ;;  %v457_v55 = vand.u32 4294901760, %v456_v54 }
  0xce   :  { %v350_v58 = vrot.slane %v349_v57, 1 }
  0xd0   :  { %v351_v62 = vadd.f32 %v350_v58, %v349_v57 }
  0xd2   :  { %v354_v0 = vadd.f32 %v353_v59, %v351_v62 }
  0xd4   :  { %v355_v1 = vmax.f32 %v354_v0, 0.0 }
  0xd6   :  { %v375_v3 = vmul.f32 %v370_v40, %v355_v1  ;;  %v374_v4 = vmul.f32 %v366_v52, %v355_v1  ;;  %v373_v5 = vmul.f32 %v362_v53, %v355_v1  ;;  %v372_v6 = vmul.f32 %v358_v60, %v355_v1  ;;  %v407_v52 = vld [vmem:[%s841_s5 + $0x8] sm:$0xff] }
  0xd7   :  { %v448_v40 = vsub.f32 %v815_v20, %v447_v30  ;;  %415 = vperm.xlu0 %676, %v407_v52  }
  0xd8   :  { %v378_v10 = vadd.f32 %v374_v4, %v321_v36  ;;  %v377_v11 = vadd.f32 %v373_v5, %v320_v33  ;;  %v376_v12 = vadd.f32 %v372_v6, %v319_v34  ;;  %v379_v13 = vadd.f32 %v375_v3, %v322_v48 }
  0xd9   :  { %v449_v49 = vand.u32 4294901760, %v448_v40 }
  0xda   :  { %v398_v16 = vadd.f32 %v390_v61, %v378_v10  ;;  %v397_v17 = vadd.f32 %v386_v7, %v377_v11  ;;  %v396_v18 = vadd.f32 %v382_v15, %v376_v12  ;;  %v399_v19 = vadd.f32 %v394_v8, %v379_v13 }
  0xdc   :  { %v402_v22 = vmax.f32 %v398_v16, 0.0  ;;  %v401_v23 = vmax.f32 %v397_v17, 0.0  ;;  %v400_v24 = vmax.f32 %v396_v18, 0.0  ;;  %v403_v25 = vmax.f32 %v399_v19, 0.0 }
  0xde   :  { %v439_v26 = vand.u32 4294901760, %v402_v22  ;;  %v441_v27 = vand.u32 4294901760, %v401_v23  ;;  %v443_v28 = vand.u32 4294901760, %v400_v24  ;;  %v437_v29 = vand.u32 4294901760, %v403_v25 }
  0xe0   :  { %v481_v32 = vsub.f32 %v402_v22, %v439_v26  ;;  %v487_v33 = vsub.f32 %v401_v23, %v441_v27  ;;  %v493_v34 = vsub.f32 %v400_v24, %v443_v28  ;;  %v475_v35 = vsub.f32 %v403_v25, %v437_v29  ;;  %438 = vmatpush.msra.mxu2 %v437_v29 }
  0xe1   :  { %625 = vmatpush.msra.mxu1 %v437_v29 }
  0xe2   :  { %v476_v36 = vand.u32 4294901760, %v475_v35  ;;  %440 = vmatpush.msra.mxu2 %v439_v26  ;;  %v482_v37 = vand.u32 4294901760, %v481_v32  ;;  %v488_v38 = vand.u32 4294901760, %v487_v33  ;;  %v494_v43 = vand.u32 4294901760, %v493_v34 }
  0xe3   :  { %627 = vmatpush.msra.mxu1 %v439_v26 }
  0xe4   :  { %v477_v41 = vsub.f32 %v475_v35, %v476_v36  ;;  %442 = vmatpush.msra.mxu2 %v441_v27  ;;  %590 = vmatpush.msra.mxu0 %v476_v36  ;;  %v483_v42 = vsub.f32 %v481_v32, %v482_v37  ;;  %v489_v46 = vsub.f32 %v487_v33, %v488_v38 }
  0xe5   :  { %629 = vmatpush.msra.mxu1 %v441_v27  ;;  %v495_v48 = vsub.f32 %v493_v34, %v494_v43 }
  0xe6   :  { %444 = vmatpush.msra.mxu2 %v443_v28  ;;  %594 = vmatpush.msra.mxu0 %v482_v37  ;;  %v478_v45 = vand.u32 4294901760, %v477_v41  ;;  %v484_v47 = vand.u32 4294901760, %v483_v42  ;;  %v490_v51 = vand.u32 4294901760, %v489_v46 }
  0xe7   :  { %631 = vmatpush.msra.mxu1 %v443_v28  ;;  %v496_v53 = vand.u32 4294901760, %v495_v48  ;;  %450 = vmatmul.f32.vlgmr.msra.gmra.mxu2 %v449_v49 }
  0xe8   :  { %521 = vmatpush.msrb.mxu2 %v475_v35  ;;  %479 = vmatpush.msra.mxu3 %v478_v45 }
  0xe9   :  { %598 = vmatpush.msra.mxu0 %v488_v38  ;;  %633 = vmatmul.f32.vlgmr.msra.gmra.mxu1 %v809_v9 }
  0xea   :  { %524 = vmatpush.msrb.mxu2 %v481_v32  ;;  %485 = vmatpush.msra.mxu3 %v484_v47 }
  0xeb   :  { %602 = vmatpush.msra.mxu0 %v494_v43 }
  0xec   :  { %527 = vmatpush.msrb.mxu2 %v487_v33  ;;  %604 = vmatmul.f32.vlgmr.msra.gmra.mxu0 %v809_v9 }
  0xed   :  { %491 = vmatpush.msra.mxu3 %v490_v51 }
  0xee   :  { %530 = vmatpush.msrb.mxu2 %v493_v34 }
  0xef   :  { %497 = vmatpush.msra.mxu3 %v496_v53  ;;  %458 = vmatmul.f32.gmra.mxu2 %v457_v55 }
  0xf0   :  { %499 = vmatmul.f32.vlgmr.msra.gmra.mxu3 %v809_v9 }
  0xf1   :  { %555 = vmatpush.msrb.mxu3 %v437_v29  ;;  %637 = vmatmul.f32.gmra.mxu1 %v453_v31 }
  0xf3   :  { %557 = vmatpush.msrb.mxu3 %v439_v26 }
  0xf4   :  { %608 = vmatmul.f32.gmra.mxu0 %v453_v31 }
  0xf5   :  { %559 = vmatpush.msrb.mxu3 %v441_v27 }
  0xf7   :  { %561 = vmatpush.msrb.mxu3 %v443_v28  ;;  %533 = vmatmul.f32.vlgmr.msrb.gmra.mxu2 %v815_v20 }
  0xf8   :  { %503 = vmatmul.f32.gmra.mxu3 %v453_v31 }
  0xff   :  { %538 = vmatmul.f32.gmra.mxu2 %v454_v44 }
 0x100   :  { %565 = vmatmul.f32.vlgmr.msrb.gmra.mxu3 %v447_v30 }
 0x108   :  { %571 = vmatmul.f32.gmra.mxu3 %v455_v50 }
 0x12f   :  { %v411_v59 = vpop.permute.xlu1 %410 }
 0x149   :  { %v416_v0 = vpop.permute.xlu0 %415 }
 0x166   :  { %v634_v4 = vpop.f32.mrf.mxu1 }
 0x169   :  { %v605_v1 = vpop.f32.mrf.mxu0 }
 0x16a   :  { %v451_v56 = vpop.f32.mrf.mxu2 }
 0x16b   :  { %v452_v61 = vadd.f32 %v451_v56, %v411_v59 }
 0x16e   :  { %v638_v15 = vpop.f32.mrf.mxu1 }
 0x171   :  { %v609_v13 = vpop.f32.mrf.mxu0 }
 0x172   :  { %v459_v58 = vpop.f32.mrf.mxu2 }
 0x173   :  { %v500_v57 = vpop.f32.mrf.mxu3  ;;  %v460_v6 = vadd.f32 %v459_v58, %v416_v0 }
 0x174   :  { %v501_v63 = vadd.f32 %v500_v57, %v452_v61 }
 0x17a   :  { %v534_v62 = vpop.f32.mrf.mxu2 }
 0x17b   :  { %v504_v60 = vpop.f32.mrf.mxu3  ;;  %v535_v2 = vadd.f32 %v534_v62, %v501_v63 }
 0x17c   :  { %v505_v10 = vadd.f32 %v504_v60, %v460_v6 }
 0x182   :  { %v539_v8 = vpop.f32.mrf.mxu2 }
 0x183   :  { %v566_v3 = vpop.f32.mrf.mxu3  ;;  %v540_v11 = vadd.f32 %v539_v8, %v505_v10 }
 0x184   :  { %v567_v5 = vadd.f32 %v566_v3, %v535_v2 }
 0x186   :  { %v606_v7 = vadd.f32 %v605_v1, %v567_v5 }
 0x188   :  { %v635_v9 = vadd.f32 %v634_v4, %v606_v7 }
 0x18a   :  { %652 = vst [vmem:[%s842_s6] sm:$0xff] %v635_v9 }
 0x18b   :  { %v572_v12 = vpop.f32.mrf.mxu3 }
 0x18c   :  { %v573_v14 = vadd.f32 %v572_v12, %v540_v11 }
 0x18e   :  { %v610_v16 = vadd.f32 %v609_v13, %v573_v14 }
 0x190   :  { %v639_v17 = vadd.f32 %v638_v15, %v610_v16 }
 0x192   :  { %v648_v18 = vmul.f32 1.442695, %v639_v17 }
 0x194   :  { %678 = vpow2.f32 %v648_v18 }
 0x19a   :  { %v679_v19 = vpop.eup %678 }
 0x19b   :  { %653 = vst [vmem:[%s842_s6 + $0x8] sm:$0xff] %v679_v19 }

</bundles_post_ra>
